<compile_context>
chip_gen: v6e
topology: v6e:2x2x1
jax: 0.10.0
libtpu: 0.0.40
codegen_flags: <defaults>
</compile_context>

<pallas_src>
import functools

import jax
import jax.numpy as jnp
from jax.experimental import pallas as pl
from jax.experimental.pallas import tpu as pltpu

BN_EPS = 1e-5
LANE = 128


def _round_up(x, m):
    return ((x + m - 1) // m) * m


def fcbnrelu_kernel(x_ref, w_ref, gamma_ref, beta_ref, o_ref, *, n_rows):
    # MXU matmul for this output-feature tile: (N, in) @ (in, tile) -> (N, tile),
    # f32 accumulation.
    y = jnp.dot(x_ref[...], w_ref[...], preferred_element_type=jnp.float32)

    # One-pass batch statistics over the batch axis (axis 0), per feature.
    inv_n = jnp.float32(1.0 / n_rows)
    sum_y = jnp.sum(y, axis=0, keepdims=True)            # (1, tile)
    sum_y2 = jnp.sum(y * y, axis=0, keepdims=True)       # (1, tile)
    mean = sum_y * inv_n
    var = jnp.maximum(sum_y2 * inv_n - mean * mean, 0.0)  # guard cancellation

    # Fold the BN affine into a single per-feature scale/shift so the
    # per-element pass is just mul + add + max.
    scale = gamma_ref[...] * jax.lax.rsqrt(var + BN_EPS)  # (1, tile)
    shift = beta_ref[...] - mean * scale                  # (1, tile)

    o_ref[...] = jnp.maximum(y * scale + shift, 0.0).astype(o_ref.dtype)


def fcbnrelu(x, w_t, gamma, beta, *, out_dtype=jnp.float32):
    """Fused Linear(no bias) + BatchNorm1d(batch stats) + ReLU.

    x:      (N, in_planes) f32
    w_t:    (in_planes, out_planes)   (== PyTorch linear.weight.T)
    gamma:  (out_planes,) or (1, out_planes)
    beta:   (out_planes,) or (1, out_planes)
    """
    n, in_planes = x.shape
    out_planes = w_t.shape[1]
    gamma = gamma.reshape(1, out_planes)
    beta = beta.reshape(1, out_planes)

    # Pad the feature axis to a lane-dense multiple of 128.
    out_pad = _round_up(out_planes, LANE)
    if out_pad != out_planes:
        pad = out_pad - out_planes
        w_t = jnp.pad(w_t, ((0, 0), (0, pad)))
        gamma = jnp.pad(gamma, ((0, 0), (0, pad)))
        beta = jnp.pad(beta, ((0, 0), (0, pad)))

    # Output-feature tile: 256 when it divides evenly (v6e/v7x MXU width),
    # else 128.  Full batch stays in each block so BN stats are exact.
    tile_out = 256 if out_pad % 256 == 0 else LANE
    grid = (out_pad // tile_out,)

    cost = pl.CostEstimate(
        flops=2 * n * in_planes * out_pad,
        transcendentals=0,
        bytes_accessed=4 * (n * in_planes + in_planes * out_pad + n * out_pad),
    )

    out = pl.pallas_call(
        functools.partial(fcbnrelu_kernel, n_rows=n),
        out_shape=jax.ShapeDtypeStruct((n, out_pad), out_dtype),
        grid=grid,
        in_specs=[
            pl.BlockSpec((n, in_planes), lambda j: (0, 0)),        # x (reused)
            pl.BlockSpec((in_planes, tile_out), lambda j: (0, j)),  # W tile
            pl.BlockSpec((1, tile_out), lambda j: (0, j)),          # gamma tile
            pl.BlockSpec((1, tile_out), lambda j: (0, j)),          # beta tile
        ],
        out_specs=pl.BlockSpec((n, tile_out), lambda j: (0, j)),
        compiler_params=pltpu.CompilerParams(
            dimension_semantics=("parallel",)),
        cost_estimate=cost,
    )(x, w_t, gamma, beta)

    if out_pad != out_planes:
        out = out[:, :out_planes]
    return out


def fcbnrelu_reference(x, w_t, gamma, beta):
    y = x @ w_t
    mean = jnp.mean(y, axis=0, keepdims=True)
    var = jnp.mean((y - mean) ** 2, axis=0, keepdims=True)
    y_hat = (y - mean) / jnp.sqrt(var + BN_EPS)
    return jnp.maximum(y_hat * gamma.reshape(1, -1) + beta.reshape(1, -1), 0.0)


# TODO(synk): BatchNorm1d running_mean/running_var buffers are not updated
# (only the train-mode forward activation is produced).

if __name__ == "__main__":
    # Small shapes consistent with FCBNReLU(in_planes=16, out_planes=32), batch 8.
    N, IN_PLANES, OUT_PLANES = 8, 16, 32

    key = jax.random.PRNGKey(0)
    kx, kw = jax.random.split(key)

    x = jax.random.normal(kx, (N, IN_PLANES), dtype=jnp.float32)

    # Deterministic parameter init (shapes per the module's __init__):
    #   nn.Linear(in_planes, out_planes, bias=False).weight : (out_planes, in_planes)
    #   nn.BatchNorm1d(out_planes).weight/bias              : (out_planes,)
    bound = 1.0 / (IN_PLANES ** 0.5)
    w = jax.random.uniform(kw, (OUT_PLANES, IN_PLANES), dtype=jnp.float32,
                           minval=-bound, maxval=bound)
    w_t = w.T                                    # (in_planes, out_planes)
    gamma = jnp.ones((OUT_PLANES,), dtype=jnp.float32)   # BN default init
    beta = jnp.zeros((OUT_PLANES,), dtype=jnp.float32)

    out = fcbnrelu(x, w_t, gamma, beta)
    out = jax.block_until_ready(out)

    ref = fcbnrelu_reference(x, w_t, gamma, beta)
    assert out.shape == (N, OUT_PLANES)
    assert jnp.allclose(out, ref, atol=1e-4, rtol=1e-4), "mismatch vs reference"

    print("KERNEL_OK")
</pallas_src>

<mosaic_0001>
module attributes {stable_mosaic.version = 11 : i64} {
  func.func @fcbnrelu_kernel(%arg0: i32, %arg1: memref<8x16xf32, #tpu.memory_space<vmem>>, %arg2: memref<16x128xf32, #tpu.memory_space<vmem>>, %arg3: memref<1x128xf32, #tpu.memory_space<vmem>>, %arg4: memref<1x128xf32, #tpu.memory_space<vmem>>, %arg5: memref<8x128xf32, #tpu.memory_space<vmem>>) attributes {dimension_semantics = [#tpu.dimension_semantics<parallel>], iteration_bounds = array<i64: 1>, scalar_prefetch = 0 : i64, scratch_operands = 0 : i64, tpu.core_type = #tpu.core_type<tc>, window_params = [{pipeline_mode = #tpu.pipeline_mode<synchronous>, transform_indices = @transform_0, window_bounds = array<i64: 8, 16>}, {transform_indices = @transform_1, window_bounds = array<i64: 16, 128>}, {transform_indices = @transform_2, window_bounds = array<i64: 1, 128>}, {transform_indices = @transform_3, window_bounds = array<i64: 1, 128>}, {transform_indices = @transform_4, window_bounds = array<i64: 8, 128>}]} {
    %c0 = arith.constant 0 : index
    %c0_0 = arith.constant 0 : index
    %0 = vector.load %arg1[%c0, %c0_0] : memref<8x16xf32, #tpu.memory_space<vmem>>, vector<8x16xf32>
    %c0_1 = arith.constant 0 : index
    %c0_2 = arith.constant 0 : index
    %1 = vector.load %arg2[%c0_1, %c0_2] : memref<16x128xf32, #tpu.memory_space<vmem>>, vector<16x128xf32>
    %cst = arith.constant dense<0.000000e+00> : vector<8x128xf32>
    %2 = tpu.matmul %0, %1, %cst {dimension_numbers = #tpu.dot_dimension_numbers<[1], [0], [0], [1], [0, 0, 1, 1], [], []>} : vector<8x16xf32>, vector<16x128xf32>, vector<8x128xf32> -> vector<8x128xf32>
    %cst_3 = arith.constant dense<0.000000e+00> : vector<128xf32>
    %3 = vector.multi_reduction <add>, %2, %cst_3 [0] : vector<8x128xf32> to vector<128xf32>
    %4 = vector.shape_cast %3 : vector<128xf32> to vector<1x128xf32>
    %5 = arith.mulf %2, %2 : vector<8x128xf32>
    %cst_4 = arith.constant dense<0.000000e+00> : vector<128xf32>
    %6 = vector.multi_reduction <add>, %5, %cst_4 [0] : vector<8x128xf32> to vector<128xf32>
    %7 = vector.shape_cast %6 : vector<128xf32> to vector<1x128xf32>
    %cst_5 = arith.constant 1.250000e-01 : f32
    %8 = vector.broadcast %cst_5 : f32 to vector<1x128xf32>
    %9 = arith.mulf %4, %8 : vector<1x128xf32>
    %cst_6 = arith.constant 1.250000e-01 : f32
    %10 = vector.broadcast %cst_6 : f32 to vector<1x128xf32>
    %11 = arith.mulf %7, %10 : vector<1x128xf32>
    %12 = arith.mulf %9, %9 : vector<1x128xf32>
    %13 = arith.subf %11, %12 : vector<1x128xf32>
    %cst_7 = arith.constant 0.000000e+00 : f32
    %14 = vector.broadcast %cst_7 : f32 to vector<1x128xf32>
    %15 = arith.maximumf %13, %14 : vector<1x128xf32>
    %c0_8 = arith.constant 0 : index
    %c0_9 = arith.constant 0 : index
    %16 = vector.load %arg3[%c0_8, %c0_9] : memref<1x128xf32, #tpu.memory_space<vmem>>, vector<1x128xf32>
    %cst_10 = arith.constant 9.99999974E-6 : f32
    %17 = vector.broadcast %cst_10 : f32 to vector<1x128xf32>
    %18 = arith.addf %15, %17 : vector<1x128xf32>
    %19 = math.rsqrt %18 : vector<1x128xf32>
    %20 = arith.mulf %16, %19 : vector<1x128xf32>
    %c0_11 = arith.constant 0 : index
    %c0_12 = arith.constant 0 : index
    %21 = vector.load %arg4[%c0_11, %c0_12] : memref<1x128xf32, #tpu.memory_space<vmem>>, vector<1x128xf32>
    %22 = arith.mulf %9, %20 : vector<1x128xf32>
    %23 = arith.subf %21, %22 : vector<1x128xf32>
    %24 = vector.broadcast %20 : vector<1x128xf32> to vector<8x128xf32>
    %25 = arith.mulf %2, %24 : vector<8x128xf32>
    %26 = vector.broadcast %23 : vector<1x128xf32> to vector<8x128xf32>
    %27 = arith.addf %25, %26 : vector<8x128xf32>
    %cst_13 = arith.constant 0.000000e+00 : f32
    %28 = vector.broadcast %cst_13 : f32 to vector<8x128xf32>
    %29 = arith.maximumf %27, %28 : vector<8x128xf32>
    %c0_14 = arith.constant 0 : index
    %c0_15 = arith.constant 0 : index
    %30 = vector.load %arg5[%c0_14, %c0_15] : memref<8x128xf32, #tpu.memory_space<vmem>>, vector<8x128xf32>
    tpu.vector_store %arg5[%c0_14, %c0_15], %29 {strides = array<i32>} : memref<8x128xf32, #tpu.memory_space<vmem>>, vector<8x128xf32>,
    return
  }
  func.func @transform_0(%arg0: i32) -> (i32, i32) {
    %c0_i32 = arith.constant 0 : i32
    %c0_i32_0 = arith.constant 0 : i32
    %c0_i32_1 = arith.constant 0 : i32
    return %c0_i32, %c0_i32_0 : i32, i32
  }
  func.func @transform_1(%arg0: i32) -> (i32, i32) {
    %c0_i32 = arith.constant 0 : i32
    %c0_i32_0 = arith.constant 0 : i32
    return %c0_i32, %arg0 : i32, i32
  }
  func.func @transform_2(%arg0: i32) -> (i32, i32) {
    %c0_i32 = arith.constant 0 : i32
    %c0_i32_0 = arith.constant 0 : i32
    return %c0_i32, %arg0 : i32, i32
  }
  func.func @transform_3(%arg0: i32) -> (i32, i32) {
    %c0_i32 = arith.constant 0 : i32
    %c0_i32_0 = arith.constant 0 : i32
    return %c0_i32, %arg0 : i32, i32
  }
  func.func @transform_4(%arg0: i32) -> (i32, i32) {
    %c0_i32 = arith.constant 0 : i32
    %c0_i32_0 = arith.constant 0 : i32
    return %c0_i32, %arg0 : i32, i32
  }
}

</mosaic_0001>

<bundles_post_ra>
// kernel: tpu_custom_call.1
= control target key start
LH: loop header
LB: loop body
LE: loop exit
PB: predicated region body
PF: predicated region fallthrough
CT: control target
= control target key end

     0   :  { %9 = vsyncpa [#allocation3], 0  ;;  %s311_s0 = inlined_call_operand.hbm [shape: f32[8,16], index: 0, kind: input, shape index: {}]   ;;  %s312_s1 = inlined_call_operand.hbm [shape: f32[16,128], index: 1, kind: input, shape index: {}]   ;;  %s313_s2 = inlined_call_operand.vmem [shape: f32[1,128], index: 2, kind: input, shape index: {}]   ;;  %s314_s3 = inlined_call_operand.vmem [shape: f32[1,128], index: 3, kind: input, shape index: {}]   ;;  %s315_s4 = inlined_call_operand.hbm [shape: f32[8,128], index: 4, kind: output, shape index: {}]  }
   0x1   :  { %10 = vsyncpa [#allocation6], 0 }
   0x2   :  { %11 = vsyncpa [#allocation4], 0  ;;  %s264_s15 = smov [#allocation2]   ;;  %s265_s17 = smov [#allocation5]  }
   0x3   :  { %s18_s16 = sshll.u32 %s264_s15, 4  ;;  %s27_s18 = sshll.u32 %s265_s17, 4  ;;  %s19_s16 = int_to_ptr.vmem [resolvable:$true] %s18_s16  ;;  %s28_s18 = int_to_ptr.vmem [resolvable:$true] %s27_s18 }
   0x4   :  { %s206_s19 = scalar_lea.vmem %s19_s16, 128  ;;  %p211_p1 = scmp.lt.s32.totalorder %s19_s16, %s19_s16 }
   0x5   :  { %p207_p0 = scmp.ne.s32.totalorder %s19_s16, %s206_s19  ;;  %p212_p2 = scmp.lt.s32.totalorder %s206_s19, %s206_s19 }
   0x7   :  { %p213_p3 = por %p212_p2, %p211_p1 }
   0x9   :  { %p214_p4 = pnand %p213_p3, %p207_p0 }
   0xb   :  { %217 = shalt.err (!%p214_p4)
}
   0xc   :  { %21 = dma.hbm_to_vmem [thread:$0]  %s311_s0, 128, %s19_s16, [#allocation3]  }
   0xd   :  { %s226_s22 = scalar_lea.vmem %s28_s18, 256  ;;  %p231_p6 = scmp.lt.s32.totalorder %s28_s18, %s28_s18 }
   0xe   :  { %p227_p5 = scmp.ne.s32.totalorder %s28_s18, %s226_s22  ;;  %p232_p7 = scmp.lt.s32.totalorder %s226_s22, %s226_s22 }
  0x10   :  { %p233_p8 = por %p232_p7, %p231_p6 }
  0x12   :  { %p234_p9 = pnand %p233_p8, %p227_p5 }
  0x14   :  { %237 = shalt.err (!%p234_p9)
}
  0x15   :  { %s266_s23 = smov 128   ;;  %s267_s24 = smov 8  }
  0x16   :  { %33 = dma.hbm_to_vmem [thread:$0]  %s312_s1, 256, %s28_s18, [#allocation6], %s266_s23, %s266_s23, %s267_s24  }
  0x17   :  { %258 = dma.done.wait [#allocation3], 128  }
  0x18   :  { %259 = vsyncadd [#allocation3], 4294967168 }
  0x19   :  { %260 = dma.done.wait [#allocation6], 256  }
  0x1a   :  { %261 = vsyncadd [#allocation6], 4294967040  ;;  %v268_v0 = vmov 0.0   ;;  %vm269_vm0 = vmmov 0   ;;  %v46_v1 = vld [vmem:[#allocation5 + $0x8] sm:$0xff]  ;;  %v45_v2 = vld [vmem:[#allocation5] sm:$0xff]  ;;  %v147_v25 = vlaneseq }
  0x1b   :  { %182 = vmatprep.subr.mxu0 %v268_v0  ;;  %186 = vmatprep.mubr.msk.f32.mxu0 %vm269_vm0, %v268_v0  ;;  %v44_v3 = vld [vmem:[#allocation2] sm:$0xff]  ;;  %vm47_vm1 = vcmask 130048   ;;  %s270_s29 = smov [#allocation7]  }
  0x1c   :  { %183 = vmatpush3.msra.mxu0 %v46_v1  ;;  %v148_v26 = vshrl.u32 %v147_v25, 7  ;;  %v139_v27 = vld [vmem:[%s313_s2] sm:$0x1]  ;;  %s168_s30 = sshll.u32 %s270_s29, 4  ;;  %s169_s30 = int_to_ptr.vmem [resolvable:$true] %s168_s30 }
  0x1d   :  { %184 = vmatprep.subr.mxu0 %v268_v0  ;;  %v143_v31 = vld [vmem:[%s314_s3] sm:$0x1]  ;;  %s238_s5 = scalar_lea.vmem %s169_s30, 128  ;;  %p243_p11 = scmp.lt.s32.totalorder %s169_s30, %s169_s30 }
  0x1e   :  { %185 = vmatpush3.msra.mxu0 %v45_v2  ;;  %v149_v28 = vsub.s32 0, %v148_v26  ;;  %p239_p10 = scmp.ne.s32.totalorder %s169_s30, %s238_s5  ;;  %p244_p12 = scmp.lt.s32.totalorder %s238_s5, %s238_s5 }
  0x1f   :  { %187 = vmatmul.mubr.msk.f32.vlgmr.msra.gmra.mxu0 %vm47_vm1, %v44_v3 }
  0x20   :  { %p245_p13 = por %p244_p12, %p243_p11 }
  0x22   :  { %p246_p0 = pnand %p245_p13, %p239_p10 }
  0xdf   :  { %v117_v4 = vpop.f32.mrf.mxu0 }
  0xe0   :  { %v121_v5 = vrot.slane %v117_v4, 4  ;;  %v127_v6 = vmul.f32 %v117_v4, %v117_v4 }
  0xe1   :  { %v188_v7 = vpop.f32.mrf.mxu0 }
  0xe2   :  { %v122_v8 = vadd.f32 %v121_v5, %v117_v4  ;;  %v128_v9 = vrot.slane %v127_v6, 4 }
  0xe4   :  { %v123_v10 = vrot.slane %v122_v8, 2  ;;  %v129_v11 = vadd.f32 %v128_v9, %v127_v6 }
  0xe6   :  { %v124_v12 = vadd.f32 %v123_v10, %v122_v8  ;;  %v130_v13 = vrot.slane %v129_v11, 2 }
  0xe8   :  { %v125_v14 = vrot.slane %v124_v12, 1  ;;  %v131_v15 = vadd.f32 %v130_v13, %v129_v11 }
  0xea   :  { %v126_v16 = vadd.f32 %v125_v14, %v124_v12  ;;  %v132_v17 = vrot.slane %v131_v15, 1 }
  0xec   :  { %v133_v18 = vadd.f32 %v132_v17, %v131_v15  ;;  %v134_v19 = vmul.f32 0.125, %v126_v16 }
  0xee   :  { %v135_v20 = vmul.f32 0.125, %v133_v18  ;;  %v136_v21 = vmul.f32 %v134_v19, %v134_v19 }
  0xf0   :  { %v137_v22 = vsub.f32 %v135_v20, %v136_v21 }
  0xf2   :  { %v138_v23 = vmax.f32 %v137_v22, 0.0 }
  0xf4   :  { %v140_v24 = vadd.f32 1e-05, %v138_v23 }
  0xf6   :  { %196 = vrsqrt.f32 %v140_v24 }
 0x103   :  { %v197_v29 = vpop.eup %196 }
 0x104   :  { %v142_v30 = vmul.f32 %v197_v29, %v139_v27 }
 0x106   :  { %v150_v32 = vrot.slane %v142_v30, %v149_v28  ;;  %v144_v33 = vmul.f32 %v142_v30, %v134_v19 }
 0x108   :  { %v145_v34 = vsub.f32 %v143_v31, %v144_v33  ;;  %v152_v35 = vmul.f32 %v150_v32, %v117_v4 }
 0x10a   :  { %v157_v36 = vrot.slane %v145_v34, %v149_v28 }
 0x10c   :  { %v159_v37 = vadd.f32 %v157_v36, %v152_v35 }
 0x10e   :  { %v160_v38 = vmax.f32 %v159_v37, 0.0 }
 0x110   :  { %161 = vst [vmem:[#allocation7] sm:$0xff] %v160_v38 }
 0x111   :  { %249 = shalt.err (!%p246_p0)
}
 0x112   :  { %171 = dma.vmem_to_hbm [thread:$0]  %s169_s30, 128, %s315_s4, [#allocation4]  }
 0x113   :  { %262 = dma.done.wait [#allocation4], 128  }
 0x114   :  { %263 = vsyncadd [#allocation4], 4294967168 }
 0x115   :  { %175 = vsyncpa [#allocation3], 1 }
 0x116   :  { %176 = vsyncpa [#allocation6], 1 }
 0x117   :  { %177 = vsyncpa [#allocation4], 1 }

</bundles_post_ra>
